<compile_context>
chip_gen: v5e
topology: v5e:2x2
jax: 0.10.0
libtpu: 0.0.40
codegen_flags: <defaults>
</compile_context>

<pallas_src>
import jax
import jax.numpy as jnp
from jax.experimental import pallas as pl
from jax.experimental.pallas import tpu as pltpu


def _attention_gate_kernel(enc_ref, dec_ref, w1_ref, w2_ref, w3_ref,
                           b12_ref, b3_ref, out_ref):
    """Blocks: enc/dec/out (Cp, ts); w1/w2/w3 (Cp, Cp); b12/b3 (Cp, 1) f32."""
    # Stage 1 (conv1 + conv2 fused): two K=C MXU contractions, f32 accumulate.
    z = (jnp.dot(w1_ref[...], enc_ref[...], preferred_element_type=jnp.float32)
         + jnp.dot(w2_ref[...], dec_ref[...], preferred_element_type=jnp.float32)
         + b12_ref[...])
    z = jnp.maximum(z, 0.0)
    # Stage 2 (conv3).
    z = jnp.dot(w3_ref[...], z.astype(w3_ref.dtype),
                preferred_element_type=jnp.float32) + b3_ref[...]
    # sigmoid(z) = 1 / (1 + exp(-z)): exp on the EUP, approx vrcp for the
    # divide, one VPU Newton step restores full f32 accuracy (VALU has slack in
    # this memory-bound kernel).  Clamp keeps exp(-z) finite for very negative z.
    d = 1.0 + jnp.exp(-jnp.maximum(z, -80.0))
    r = pl.reciprocal(d, approx=True)
    gate = r * (2.0 - d * r)
    # Re-read the enc tile right before the gate (keeps its live range short).
    out_ref[...] = (enc_ref[...].astype(jnp.float32) * gate).astype(out_ref.dtype)


def _pick_spatial_tile(S, Cp, n_batch, io_itemsize, vmem_cap, target_lanes=2048):
    """Largest lane-aligned (multiple-of-128) spatial tile that fits the
    activation VMEM budget; prefers exact divisors of the 128-padded S to
    avoid boundary padding, and keeps >= 2 grid steps when N == 1 so both v7x
    TensorCores get work."""
    S128 = pl.cdiv(S, 128) * 128
    act_budget = vmem_cap // 4
    # enc/dec/out double-buffered at I/O width + ~4 f32 temporaries per lane.
    bytes_per_lane = Cp * (6 * io_itemsize + 16)
    ts_max = (act_budget // bytes_per_lane) // 128 * 128
    ts_max = max(128, min(target_lanes, S128, ts_max))
    best_div, t = 128, 128
    while t <= ts_max:
        if S128 % t == 0:
            best_div = t
        t += 128
    # Take an exact divisor unless it is much smaller than the cap (then pad).
    ts = best_div if 2 * best_div >= ts_max else ts_max
    if n_batch == 1 and S128 > 128 and pl.cdiv(S128, ts) < 2:
        ts = max(128, (S128 // 2) // 128 * 128)
    return ts


def attention_gate(enc, dec, params, *, spatial_tile=None):
    """enc, dec: (N, C, H, W). params: w1,w2,w3 as (C_out, C_in); b1,b2,b3 (C,)."""
    N, C, H, W = enc.shape
    S = H * W
    io_dtype = enc.dtype
    io_itemsize = jnp.dtype(io_dtype).itemsize

    try:
        vmem_cap = int(pltpu.get_tpu_info().vmem_capacity_bytes)
    except Exception:
        vmem_cap = 64 * 1024 * 1024  # conservative (v7x per-TC)

    # Pad channels to a sublane-friendly multiple of 8 (>= 8); padded output
    # channels / lanes come out as zeros and are sliced off below.
    Cp = max(8, ((C + 7) // 8) * 8)

    ts = (_pick_spatial_tile(S, Cp, N, io_itemsize, vmem_cap)
          if spatial_tile is None else spatial_tile)
    S_pad = pl.cdiv(S, ts) * ts

    # Free reshape NCHW -> (N, C, S), then zero-pad channels / spatial.
    enc3 = enc.reshape(N, C, S)
    dec3 = dec.reshape(N, C, S)
    if Cp != C or S_pad != S:
        pad = ((0, 0), (0, Cp - C), (0, S_pad - S))
        enc3 = jnp.pad(enc3, pad)
        dec3 = jnp.pad(dec3, pad)

    def pad_w(w):
        return jnp.pad(w, ((0, Cp - C), (0, Cp - C))).astype(io_dtype)

    def pad_b(b):
        return jnp.pad(b, (0, Cp - C)).astype(jnp.float32).reshape(Cp, 1)

    w1 = pad_w(params["w1"])
    w2 = pad_w(params["w2"])
    w3 = pad_w(params["w3"])
    b12 = pad_b(params["b1"] + params["b2"])   # conv1+conv2 biases fused once
    b3 = pad_b(params["b3"])

    grid = (N, S_pad // ts)
    R = N * S_pad
    cost = pl.CostEstimate(
        flops=int(6 * R * Cp * Cp + 6 * R * Cp),
        transcendentals=int(2 * R * Cp),
        bytes_accessed=int(3 * R * Cp * io_itemsize + (3 * Cp * Cp + 2 * Cp) * 4),
    )

    def run(single_buffer_weights):
        act_spec = pl.BlockSpec((None, Cp, ts), lambda n, s: (n, 0, s))

        def const_spec(shape):
            if single_buffer_weights:
                return pl.BlockSpec(shape, lambda n, s: (0, 0),
                                    pipeline_mode=pl.Buffered(1))
            return pl.BlockSpec(shape, lambda n, s: (0, 0))

        w_buf = 1 if single_buffer_weights else 2
        est = (3 * 2 * Cp * ts * io_itemsize          # double-buffered I/O tiles
               + w_buf * (3 * Cp * Cp + 2 * Cp) * 4   # weights / biases
               + 4 * Cp * ts * 4                      # f32 in-kernel temporaries
               + (2 << 20))                           # headroom
        vmem_limit = int(min(max(int(1.5 * est), 16 * 1024 * 1024),
                             (vmem_cap * 5) // 8))

        return pl.pallas_call(
            _attention_gate_kernel,
            out_shape=jax.ShapeDtypeStruct((N, Cp, S_pad), io_dtype),
            grid_spec=pltpu.PrefetchScalarGridSpec(
                num_scalar_prefetch=0,
                grid=grid,
                in_specs=[act_spec, act_spec,
                          const_spec((Cp, Cp)), const_spec((Cp, Cp)),
                          const_spec((Cp, Cp)),
                          const_spec((Cp, 1)), const_spec((Cp, 1))],
                out_specs=act_spec,
            ),
            compiler_params=pltpu.CompilerParams(
                dimension_semantics=("parallel", "parallel"),
                vmem_limit_bytes=vmem_limit,
            ),
            cost_estimate=cost,
        )(enc3, dec3, w1, w2, w3, b12, b3)

    try:
        out3 = run(single_buffer_weights=True)
    except Exception:
        # pl.Buffered(1) on BlockSpec not supported by this JAX/Mosaic build;
        # fall back to default double-buffering for the (tiny) constants.
        out3 = run(single_buffer_weights=False)

    return out3[:, :C, :S].reshape(N, C, H, W)


def attention_gate_ref(enc, dec, params):
    """Pure-JAX reference (same math as the PyTorch module)."""
    N, C, H, W = enc.shape
    e = enc.reshape(N, C, H * W)
    d = dec.reshape(N, C, H * W)
    x = jnp.einsum("oc,ncs->nos", params["w1"], e) + params["b1"][None, :, None]
    y = jnp.einsum("oc,ncs->nos", params["w2"], d) + params["b2"][None, :, None]
    z = jax.nn.relu(x + y)
    z = jax.nn.sigmoid(
        jnp.einsum("oc,ncs->nos", params["w3"], z) + params["b3"][None, :, None])
    return (e * z).reshape(N, C, H, W)


def init_params(key, nch):
    """Deterministic init matching Conv2d(nch, nch, (1,1)): weight stored as
    (C_out, C_in) == torch_weight[:, :, 0, 0], bias (nch,)."""
    ks = jax.random.split(key, 6)
    bound = 1.0 / (nch ** 0.5)

    def u(k, shape):
        return jax.random.uniform(k, shape, jnp.float32, -bound, bound)

    return {
        "w1": u(ks[0], (nch, nch)), "b1": u(ks[1], (nch,)),
        "w2": u(ks[2], (nch, nch)), "b2": u(ks[3], (nch,)),
        "w3": u(ks[4], (nch, nch)), "b3": u(ks[5], (nch,)),
    }


if __name__ == "__main__":
    key = jax.random.PRNGKey(0)
    k_enc, k_dec, k_par, k_enc2, k_dec2, k_par2 = jax.random.split(key, 6)

    # Small shapes consistent with the module.
    N, C, H, W = 2, 4, 16, 16
    enc = jax.random.normal(k_enc, (N, C, H, W), jnp.float32)
    dec = jax.random.normal(k_dec, (N, C, H, W), jnp.float32)
    params = init_params(k_par, C)

    out = jax.block_until_ready(attention_gate(enc, dec, params))
    ref = attention_gate_ref(enc, dec, params)
    assert out.shape == (N, C, H, W)
    assert jnp.allclose(out, ref, atol=1e-4, rtol=1e-4), "mismatch vs reference"

    # Odd shape: exercises channel padding (5 -> 8) and spatial padding (99 -> 128).
    N2, C2, H2, W2 = 1, 5, 9, 11
    enc2 = jax.random.normal(k_enc2, (N2, C2, H2, W2), jnp.float32)
    dec2 = jax.random.normal(k_dec2, (N2, C2, H2, W2), jnp.float32)
    params2 = init_params(k_par2, C2)
    out2 = jax.block_until_ready(attention_gate(enc2, dec2, params2))
    ref2 = attention_gate_ref(enc2, dec2, params2)
    assert out2.shape == (N2, C2, H2, W2)
    assert jnp.allclose(out2, ref2, atol=1e-4, rtol=1e-4), "mismatch (padded path)"

    print("KERNEL_OK")
</pallas_src>

<mosaic_0001>
module attributes {stable_mosaic.version = 11 : i64} {
  func.func @_attention_gate_kernel(%arg0: i32, %arg1: i32, %arg2: memref<1x8x256xf32, #tpu.memory_space<vmem>>, %arg3: memref<1x8x256xf32, #tpu.memory_space<vmem>>, %arg4: memref<8x8xf32, #tpu.memory_space<vmem>>, %arg5: memref<8x8xf32, #tpu.memory_space<vmem>>, %arg6: memref<8x8xf32, #tpu.memory_space<vmem>>, %arg7: memref<8x1xf32, #tpu.memory_space<vmem>>, %arg8: memref<8x1xf32, #tpu.memory_space<vmem>>, %arg9: memref<1x8x256xf32, #tpu.memory_space<vmem>>) attributes {dimension_semantics = [#tpu.dimension_semantics<parallel>, #tpu.dimension_semantics<parallel>], iteration_bounds = array<i64: 2, 1>, scalar_prefetch = 0 : i64, scratch_operands = 0 : i64, tpu.core_type = #tpu.core_type<tc>, window_params = [{transform_indices = @transform_0, window_bounds = array<i64: 1, 8, 256>}, {transform_indices = @transform_1, window_bounds = array<i64: 1, 8, 256>}, {pipeline_mode = #tpu.pipeline_mode<synchronous>, transform_indices = @transform_2, window_bounds = array<i64: 8, 8>}, {pipeline_mode = #tpu.pipeline_mode<synchronous>, transform_indices = @transform_3, window_bounds = array<i64: 8, 8>}, {pipeline_mode = #tpu.pipeline_mode<synchronous>, transform_indices = @transform_4, window_bounds = array<i64: 8, 8>}, {pipeline_mode = #tpu.pipeline_mode<synchronous>, transform_indices = @transform_5, window_bounds = array<i64: 8, 1>}, {pipeline_mode = #tpu.pipeline_mode<synchronous>, transform_indices = @transform_6, window_bounds = array<i64: 8, 1>}, {transform_indices = @transform_7, window_bounds = array<i64: 1, 8, 256>}]} {
    %c0 = arith.constant 0 : index
    %c0_0 = arith.constant 0 : index
    %0 = vector.load %arg4[%c0, %c0_0] : memref<8x8xf32, #tpu.memory_space<vmem>>, vector<8x8xf32>
    %c0_1 = arith.constant 0 : index
    %c0_2 = arith.constant 0 : index
    %c0_3 = arith.constant 0 : index
    %1 = vector.load %arg2[%c0_1, %c0_2, %c0_3] : memref<1x8x256xf32, #tpu.memory_space<vmem>>, vector<1x8x256xf32>
    %2 = vector.shape_cast %1 : vector<1x8x256xf32> to vector<8x256xf32>
    %cst = arith.constant dense<0.000000e+00> : vector<8x256xf32>
    %3 = tpu.matmul %0, %2, %cst {dimension_numbers = #tpu.dot_dimension_numbers<[1], [0], [0], [1], [0, 0, 1, 1], [], []>} : vector<8x8xf32>, vector<8x256xf32>, vector<8x256xf32> -> vector<8x256xf32>
    %c0_4 = arith.constant 0 : index
    %c0_5 = arith.constant 0 : index
    %4 = vector.load %arg5[%c0_4, %c0_5] : memref<8x8xf32, #tpu.memory_space<vmem>>, vector<8x8xf32>
    %c0_6 = arith.constant 0 : index
    %c0_7 = arith.constant 0 : index
    %c0_8 = arith.constant 0 : index
    %5 = vector.load %arg3[%c0_6, %c0_7, %c0_8] : memref<1x8x256xf32, #tpu.memory_space<vmem>>, vector<1x8x256xf32>
    %6 = vector.shape_cast %5 : vector<1x8x256xf32> to vector<8x256xf32>
    %cst_9 = arith.constant dense<0.000000e+00> : vector<8x256xf32>
    %7 = tpu.matmul %4, %6, %cst_9 {dimension_numbers = #tpu.dot_dimension_numbers<[1], [0], [0], [1], [0, 0, 1, 1], [], []>} : vector<8x8xf32>, vector<8x256xf32>, vector<8x256xf32> -> vector<8x256xf32>
    %8 = arith.addf %3, %7 : vector<8x256xf32>
    %c0_10 = arith.constant 0 : index
    %c0_11 = arith.constant 0 : index
    %9 = vector.load %arg7[%c0_10, %c0_11] : memref<8x1xf32, #tpu.memory_space<vmem>>, vector<8x1xf32>
    %10 = vector.broadcast %9 : vector<8x1xf32> to vector<8x256xf32>
    %11 = arith.addf %8, %10 : vector<8x256xf32>
    %cst_12 = arith.constant 0.000000e+00 : f32
    %12 = vector.broadcast %cst_12 : f32 to vector<8x256xf32>
    %13 = arith.maximumf %11, %12 : vector<8x256xf32>
    %c0_13 = arith.constant 0 : index
    %c0_14 = arith.constant 0 : index
    %14 = vector.load %arg6[%c0_13, %c0_14] : memref<8x8xf32, #tpu.memory_space<vmem>>, vector<8x8xf32>
    %cst_15 = arith.constant dense<0.000000e+00> : vector<8x256xf32>
    %15 = tpu.matmul %14, %13, %cst_15 {dimension_numbers = #tpu.dot_dimension_numbers<[1], [0], [0], [1], [0, 0, 1, 1], [], []>} : vector<8x8xf32>, vector<8x256xf32>, vector<8x256xf32> -> vector<8x256xf32>
    %c0_16 = arith.constant 0 : index
    %c0_17 = arith.constant 0 : index
    %16 = vector.load %arg8[%c0_16, %c0_17] : memref<8x1xf32, #tpu.memory_space<vmem>>, vector<8x1xf32>
    %17 = vector.broadcast %16 : vector<8x1xf32> to vector<8x256xf32>
    %18 = arith.addf %15, %17 : vector<8x256xf32>
    %cst_18 = arith.constant -8.000000e+01 : f32
    %19 = vector.broadcast %cst_18 : f32 to vector<8x256xf32>
    %20 = arith.maximumf %18, %19 : vector<8x256xf32>
    %cst_19 = arith.constant 0.000000e+00 : f32
    %21 = vector.broadcast %cst_19 : f32 to vector<8x256xf32>
    %22 = arith.subf %21, %20 : vector<8x256xf32>
    %23 = math.exp %22 : vector<8x256xf32>
    %cst_20 = arith.constant 1.000000e+00 : f32
    %24 = vector.broadcast %cst_20 : f32 to vector<8x256xf32>
    %25 = arith.addf %24, %23 : vector<8x256xf32>
    %26 = tpu.reciprocal %25 {approx = true} : vector<8x256xf32> -> vector<8x256xf32>
    %27 = arith.mulf %25, %26 : vector<8x256xf32>
    %cst_21 = arith.constant 2.000000e+00 : f32
    %28 = vector.broadcast %cst_21 : f32 to vector<8x256xf32>
    %29 = arith.subf %28, %27 : vector<8x256xf32>
    %30 = arith.mulf %26, %29 : vector<8x256xf32>
    %c0_22 = arith.constant 0 : index
    %c0_23 = arith.constant 0 : index
    %c0_24 = arith.constant 0 : index
    %31 = vector.load %arg2[%c0_22, %c0_23, %c0_24] : memref<1x8x256xf32, #tpu.memory_space<vmem>>, vector<1x8x256xf32>
    %32 = vector.shape_cast %31 : vector<1x8x256xf32> to vector<8x256xf32>
    %33 = arith.mulf %32, %30 : vector<8x256xf32>
    %c0_25 = arith.constant 0 : index
    %c0_26 = arith.constant 0 : index
    %c0_27 = arith.constant 0 : index
    %34 = vector.load %arg9[%c0_25, %c0_26, %c0_27] : memref<1x8x256xf32, #tpu.memory_space<vmem>>, vector<1x8x256xf32>
    %35 = vector.shape_cast %34 : vector<1x8x256xf32> to vector<8x256xf32>
    %36 = vector.shape_cast %33 : vector<8x256xf32> to vector<1x8x256xf32>
    tpu.vector_store %arg9[%c0_25, %c0_26, %c0_27], %36 {strides = array<i32>} : memref<1x8x256xf32, #tpu.memory_space<vmem>>, vector<1x8x256xf32>,
    return
  }
  func.func @transform_0(%arg0: i32, %arg1: i32) -> (i32, i32, i32) {
    %c0_i32 = arith.constant 0 : i32
    %c0_i32_0 = arith.constant 0 : i32
    return %arg0, %c0_i32, %arg1 : i32, i32, i32
  }
  func.func @transform_1(%arg0: i32, %arg1: i32) -> (i32, i32, i32) {
    %c0_i32 = arith.constant 0 : i32
    %c0_i32_0 = arith.constant 0 : i32
    return %arg0, %c0_i32, %arg1 : i32, i32, i32
  }
  func.func @transform_2(%arg0: i32, %arg1: i32) -> (i32, i32) {
    %c0_i32 = arith.constant 0 : i32
    %c0_i32_0 = arith.constant 0 : i32
    %c0_i32_1 = arith.constant 0 : i32
    return %c0_i32, %c0_i32_0 : i32, i32
  }
  func.func @transform_3(%arg0: i32, %arg1: i32) -> (i32, i32) {
    %c0_i32 = arith.constant 0 : i32
    %c0_i32_0 = arith.constant 0 : i32
    %c0_i32_1 = arith.constant 0 : i32
    return %c0_i32, %c0_i32_0 : i32, i32
  }
  func.func @transform_4(%arg0: i32, %arg1: i32) -> (i32, i32) {
    %c0_i32 = arith.constant 0 : i32
    %c0_i32_0 = arith.constant 0 : i32
    %c0_i32_1 = arith.constant 0 : i32
    return %c0_i32, %c0_i32_0 : i32, i32
  }
  func.func @transform_5(%arg0: i32, %arg1: i32) -> (i32, i32) {
    %c0_i32 = arith.constant 0 : i32
    %c0_i32_0 = arith.constant 0 : i32
    %c0_i32_1 = arith.constant 0 : i32
    return %c0_i32, %c0_i32_0 : i32, i32
  }
  func.func @transform_6(%arg0: i32, %arg1: i32) -> (i32, i32) {
    %c0_i32 = arith.constant 0 : i32
    %c0_i32_0 = arith.constant 0 : i32
    %c0_i32_1 = arith.constant 0 : i32
    return %c0_i32, %c0_i32_0 : i32, i32
  }
  func.func @transform_7(%arg0: i32, %arg1: i32) -> (i32, i32, i32) {
    %c0_i32 = arith.constant 0 : i32
    %c0_i32_0 = arith.constant 0 : i32
    return %arg0, %c0_i32, %arg1 : i32, i32, i32
  }
}

module attributes {stable_mosaic.version = 11 : i64} {
  func.func @_attention_gate_kernel(%arg0: i32, %arg1: i32, %arg2: memref<1x8x256xf32, #tpu.memory_space<vmem>>, %arg3: memref<1x8x256xf32, #tpu.memory_space<vmem>>, %arg4: memref<8x8xf32, #tpu.memory_space<vmem>>, %arg5: memref<8x8xf32, #tpu.memory_space<vmem>>, %arg6: memref<8x8xf32, #tpu.memory_space<vmem>>, %arg7: memref<8x1xf32, #tpu.memory_space<vmem>>, %arg8: memref<8x1xf32, #tpu.memory_space<vmem>>, %arg9: memref<1x8x256xf32, #tpu.memory_space<vmem>>) attributes {dimension_semantics = [#tpu.dimension_semantics<parallel>, #tpu.dimension_semantics<parallel>], iteration_bounds = array<i64: 2, 1>, scalar_prefetch = 0 : i64, scratch_operands = 0 : i64, tpu.core_type = #tpu.core_type<tc>, window_params = [{transform_indices = @transform_0, window_bounds = array<i64: 1, 8, 256>}, {transform_indices = @transform_1, window_bounds = array<i64: 1, 8, 256>}, {pipeline_mode = #tpu.pipeline_mode<synchronous>, transform_indices = @transform_2, window_bounds = array<i64: 8, 8>}, {pipeline_mode = #tpu.pipeline_mode<synchronous>, transform_indices = @transform_3, window_bounds = array<i64: 8, 8>}, {pipeline_mode = #tpu.pipeline_mode<synchronous>, transform_indices = @transform_4, window_bounds = array<i64: 8, 8>}, {pipeline_mode = #tpu.pipeline_mode<synchronous>, transform_indices = @transform_5, window_bounds = array<i64: 8, 1>}, {pipeline_mode = #tpu.pipeline_mode<synchronous>, transform_indices = @transform_6, window_bounds = array<i64: 8, 1>}, {transform_indices = @transform_7, window_bounds = array<i64: 1, 8, 256>}]} {
    %c0 = arith.constant 0 : index
    %c0_0 = arith.constant 0 : index
    %0 = vector.load %arg4[%c0, %c0_0] : memref<8x8xf32, #tpu.memory_space<vmem>>, vector<8x8xf32>
    %c0_1 = arith.constant 0 : index
    %c0_2 = arith.constant 0 : index
    %c0_3 = arith.constant 0 : index
    %1 = vector.load %arg2[%c0_1, %c0_2, %c0_3] : memref<1x8x256xf32, #tpu.memory_space<vmem>>, vector<1x8x256xf32>
    %2 = vector.shape_cast %1 : vector<1x8x256xf32> to vector<8x256xf32>
    %cst = arith.constant dense<0.000000e+00> : vector<8x256xf32>
    %3 = tpu.matmul %0, %2, %cst {dimension_numbers = #tpu.dot_dimension_numbers<[1], [0], [0], [1], [0, 0, 1, 1], [], []>} : vector<8x8xf32>, vector<8x256xf32>, vector<8x256xf32> -> vector<8x256xf32>
    %c0_4 = arith.constant 0 : index
    %c0_5 = arith.constant 0 : index
    %4 = vector.load %arg5[%c0_4, %c0_5] : memref<8x8xf32, #tpu.memory_space<vmem>>, vector<8x8xf32>
    %c0_6 = arith.constant 0 : index
    %c0_7 = arith.constant 0 : index
    %c0_8 = arith.constant 0 : index
    %5 = vector.load %arg3[%c0_6, %c0_7, %c0_8] : memref<1x8x256xf32, #tpu.memory_space<vmem>>, vector<1x8x256xf32>
    %6 = vector.shape_cast %5 : vector<1x8x256xf32> to vector<8x256xf32>
    %cst_9 = arith.constant dense<0.000000e+00> : vector<8x256xf32>
    %7 = tpu.matmul %4, %6, %cst_9 {dimension_numbers = #tpu.dot_dimension_numbers<[1], [0], [0], [1], [0, 0, 1, 1], [], []>} : vector<8x8xf32>, vector<8x256xf32>, vector<8x256xf32> -> vector<8x256xf32>
    %8 = arith.addf %3, %7 : vector<8x256xf32>
    %c0_10 = arith.constant 0 : index
    %c0_11 = arith.constant 0 : index
    %9 = vector.load %arg7[%c0_10, %c0_11] : memref<8x1xf32, #tpu.memory_space<vmem>>, vector<8x1xf32>
    %10 = vector.broadcast %9 : vector<8x1xf32> to vector<8x256xf32>
    %11 = arith.addf %8, %10 : vector<8x256xf32>
    %cst_12 = arith.constant 0.000000e+00 : f32
    %12 = vector.broadcast %cst_12 : f32 to vector<8x256xf32>
    %13 = arith.maximumf %11, %12 : vector<8x256xf32>
    %c0_13 = arith.constant 0 : index
    %c0_14 = arith.constant 0 : index
    %14 = vector.load %arg6[%c0_13, %c0_14] : memref<8x8xf32, #tpu.memory_space<vmem>>, vector<8x8xf32>
    %cst_15 = arith.constant dense<0.000000e+00> : vector<8x256xf32>
    %15 = tpu.matmul %14, %13, %cst_15 {dimension_numbers = #tpu.dot_dimension_numbers<[1], [0], [0], [1], [0, 0, 1, 1], [], []>} : vector<8x8xf32>, vector<8x256xf32>, vector<8x256xf32> -> vector<8x256xf32>
    %c0_16 = arith.constant 0 : index
    %c0_17 = arith.constant 0 : index
    %16 = vector.load %arg8[%c0_16, %c0_17] : memref<8x1xf32, #tpu.memory_space<vmem>>, vector<8x1xf32>
    %17 = vector.broadcast %16 : vector<8x1xf32> to vector<8x256xf32>
    %18 = arith.addf %15, %17 : vector<8x256xf32>
    %cst_18 = arith.constant -8.000000e+01 : f32
    %19 = vector.broadcast %cst_18 : f32 to vector<8x256xf32>
    %20 = arith.maximumf %18, %19 : vector<8x256xf32>
    %cst_19 = arith.constant 0.000000e+00 : f32
    %21 = vector.broadcast %cst_19 : f32 to vector<8x256xf32>
    %22 = arith.subf %21, %20 : vector<8x256xf32>
    %23 = math.exp %22 : vector<8x256xf32>
    %cst_20 = arith.constant 1.000000e+00 : f32
    %24 = vector.broadcast %cst_20 : f32 to vector<8x256xf32>
    %25 = arith.addf %24, %23 : vector<8x256xf32>
    %26 = tpu.reciprocal %25 {approx = true} : vector<8x256xf32> -> vector<8x256xf32>
    %27 = arith.mulf %25, %26 : vector<8x256xf32>
    %cst_21 = arith.constant 2.000000e+00 : f32
    %28 = vector.broadcast %cst_21 : f32 to vector<8x256xf32>
    %29 = arith.subf %28, %27 : vector<8x256xf32>
    %30 = arith.mulf %26, %29 : vector<8x256xf32>
    %c0_22 = arith.constant 0 : index
    %c0_23 = arith.constant 0 : index
    %c0_24 = arith.constant 0 : index
    %31 = vector.load %arg2[%c0_22, %c0_23, %c0_24] : memref<1x8x256xf32, #tpu.memory_space<vmem>>, vector<1x8x256xf32>
    %32 = vector.shape_cast %31 : vector<1x8x256xf32> to vector<8x256xf32>
    %33 = arith.mulf %32, %30 : vector<8x256xf32>
    %c0_25 = arith.constant 0 : index
    %c0_26 = arith.constant 0 : index
    %c0_27 = arith.constant 0 : index
    %34 = vector.load %arg9[%c0_25, %c0_26, %c0_27] : memref<1x8x256xf32, #tpu.memory_space<vmem>>, vector<1x8x256xf32>
    %35 = vector.shape_cast %34 : vector<1x8x256xf32> to vector<8x256xf32>
    %36 = vector.shape_cast %33 : vector<8x256xf32> to vector<1x8x256xf32>
    tpu.vector_store %arg9[%c0_25, %c0_26, %c0_27], %36 {strides = array<i32>} : memref<1x8x256xf32, #tpu.memory_space<vmem>>, vector<1x8x256xf32>,
    return
  }
  func.func @transform_0(%arg0: i32, %arg1: i32) -> (i32, i32, i32) {
    %c0_i32 = arith.constant 0 : i32
    %c0_i32_0 = arith.constant 0 : i32
    return %arg0, %c0_i32, %arg1 : i32, i32, i32
  }
  func.func @transform_1(%arg0: i32, %arg1: i32) -> (i32, i32, i32) {
    %c0_i32 = arith.constant 0 : i32
    %c0_i32_0 = arith.constant 0 : i32
    return %arg0, %c0_i32, %arg1 : i32, i32, i32
  }
  func.func @transform_2(%arg0: i32, %arg1: i32) -> (i32, i32) {
    %c0_i32 = arith.constant 0 : i32
    %c0_i32_0 = arith.constant 0 : i32
    %c0_i32_1 = arith.constant 0 : i32
    return %c0_i32, %c0_i32_0 : i32, i32
  }
  func.func @transform_3(%arg0: i32, %arg1: i32) -> (i32, i32) {
    %c0_i32 = arith.constant 0 : i32
    %c0_i32_0 = arith.constant 0 : i32
    %c0_i32_1 = arith.constant 0 : i32
    return %c0_i32, %c0_i32_0 : i32, i32
  }
  func.func @transform_4(%arg0: i32, %arg1: i32) -> (i32, i32) {
    %c0_i32 = arith.constant 0 : i32
    %c0_i32_0 = arith.constant 0 : i32
    %c0_i32_1 = arith.constant 0 : i32
    return %c0_i32, %c0_i32_0 : i32, i32
  }
  func.func @transform_5(%arg0: i32, %arg1: i32) -> (i32, i32) {
    %c0_i32 = arith.constant 0 : i32
    %c0_i32_0 = arith.constant 0 : i32
    %c0_i32_1 = arith.constant 0 : i32
    return %c0_i32, %c0_i32_0 : i32, i32
  }
  func.func @transform_6(%arg0: i32, %arg1: i32) -> (i32, i32) {
    %c0_i32 = arith.constant 0 : i32
    %c0_i32_0 = arith.constant 0 : i32
    %c0_i32_1 = arith.constant 0 : i32
    return %c0_i32, %c0_i32_0 : i32, i32
  }
  func.func @transform_7(%arg0: i32, %arg1: i32) -> (i32, i32, i32) {
    %c0_i32 = arith.constant 0 : i32
    %c0_i32_0 = arith.constant 0 : i32
    return %arg0, %c0_i32, %arg1 : i32, i32, i32
  }
}

</mosaic_0001>

<bundles_post_ra>
// kernel: tpu_custom_call.1
= control target key start
LH: loop header
LB: loop body
LE: loop exit
PB: predicated region body
PF: predicated region fallthrough
CT: control target
= control target key end

     0   :  { %s1216_s0 = inlined_call_operand.hbm [shape: f32[2,8,256], index: 0, kind: input, shape index: {}]   ;;  %s1217_s1 = inlined_call_operand.hbm [shape: f32[2,8,256], index: 1, kind: input, shape index: {}]   ;;  %s1218_s2 = inlined_call_operand.vmem [shape: f32[8,8], index: 2, kind: input, shape index: {}]   ;;  %s1219_s3 = inlined_call_operand.vmem [shape: f32[8,8], index: 3, kind: input, shape index: {}]   ;;  %s1220_s4 = inlined_call_operand.hbm [shape: f32[8,8], index: 4, kind: input, shape index: {}]   ;;  %s1221_s5 = inlined_call_operand.vmem [shape: f32[8,1], index: 5, kind: input, shape index: {}]   ;;  %s1222_s6 = inlined_call_operand.vmem [shape: f32[8,1], index: 6, kind: input, shape index: {}]   ;;  %s1223_s7 = inlined_call_operand.hbm [shape: f32[2,8,256], index: 7, kind: output, shape index: {}]  }
   0x1   :  { %1231 = sst [smem:[#allocation19_spill]] %s1220_s4 }
   0x2   :  { %1232 = sst [smem:[#allocation20_spill]] %s1223_s7 }
   0x3   :  { %12 = vsyncpa [#allocation3], 0 }
   0x4   :  { %14 = vsyncpa [#allocation3 + $0x1], 0 }
   0x5   :  { %15 = vsyncpa [#allocation6], 0 }
   0x6   :  { %17 = vsyncpa [#allocation6 + $0x1], 0 }
   0x7   :  { %18 = vsyncpa [#allocation4], 0 }
   0x8   :  { %20 = vsyncpa [#allocation4 + $0x1], 0  ;;  %s1031_s24 = smov 0   ;;  %s1033_s25 = smov 0  }
   0x9   :  { %s1035_s26 = smov 0   ;;  %s1037_s27 = smov 0  }
   0xa   :  { %s1039_s28 = smov 0   ;;  %s1041_s29 = smov 0  }
   0xb LB: > { %1233 = sst [smem:[#allocation13_spill]] %s967_s24  ;;  %s1062_s30 = sadd.s32 4294967295, %s987_s29   ;;  %s987_s29 = sphi %s1041_s29, %s26_s29   ;;  %s983_s28 = sphi %s1039_s28, %s1251_s28   ;;  %s979_s27 = sphi %s1037_s27, %s1250_s27   ;;  %s975_s26 = sphi %s1035_s26, %s1254_s26   ;;  %s971_s25 = sphi %s1033_s25, %s1253_s25   ;;  %s967_s24 = sphi %s1031_s24, %s1252_s24  }
   0xc   : > { %1234 = sst [smem:[#allocation14_spill]] %s983_s28  ;;  %s690_s8 = sadd.s32 4294967294, %s987_s29  }
   0xd   : > { %p60_p0 = scmp.ne.s32.totalorder %s971_s25, %s967_s24  ;;  %p61_p1 = scmp.eq.s32.totalorder %s1062_s30, 0 }
   0xe   : > { %p219_p2 = scmp.eq.s32.totalorder %s1062_s30, 1  ;;  %p225_p3 = scmp.eq.s32.totalorder %s690_s8, 1 }
   0xf   : > { %p1071_p4 = por %p61_p1, %p60_p0  ;;  %p691_p5 = scmp.ge.s32.totalorder %s987_s29, 1 }
  0x10   : > { %p1076_p6 = por %p225_p3, %p60_p0  ;;  %p232_p7 = scmp.lt.s32.totalorder %s987_s29, 3 }
  0x11   : > { %s1238_s4 = sld [smem:[#allocation19_spill]]  ;;  %p693_p9 = scmp.ge.s32.totalorder %s987_s29, 2 }
  0x12   : > { %s1236_s10 = scalar_select %p1076_p6, 1, 0 }
  0x13   : > { %p1084_p8 = pnand %p691_p5, %p232_p7  ;;  %s989_s15 = smov [#allocation7]  }
  0x14   : > { %1237 = sst [smem:[#allocation15_spill]] %s1236_s10  ;;  %s252_s16 = sshll.u32 %s989_s15, 4  ;;  %s253_s16 = int_to_ptr.vmem [resolvable:$true] %s252_s16 }
  0x15   : > { %p729_p10 = pneg %p1084_p8  ;;  %s38_s17 = sadd.s32 1, %s983_s28 }
  0x16   : > { %p40_p12 = scmp.ge.s32.totalorder %s38_s17, 2  ;;  %s47_s18 = sadd.s32 1, %s975_s26 }
  0x17   : > { %s250_s13 = sshll.u32 %s1238_s4, 4  ;;  %p730_p11 = pnand %p729_p10, %p61_p1  ;;  %s251_s13 = int_to_ptr.hbm [resolvable:$true] %s250_s13 }
  0x18   : > { %p54_p13 = scmp.ne.s32.totalorder %s975_s26, %s971_s25  ;;  %p55_p0 = scmp.eq.s32.totalorder %s987_s29, 0 }
  0x19   : > { %732 = dma.hbm_to_vmem [thread:$0]  (!%p730_p11), %s251_s13, 128, %s253_s16, [#allocation6]  }
  0x1a   : > { %s1256_s17 = smov (%p40_p12, %s38_s17), 0  ;;  %p1100_p3 = por %p55_p0, %p54_p13 }
  0x1b   : > { %1240 = sst [smem:[#allocation16_spill]] %s1256_s17  ;;  %p1106_p5 = por %p219_p2, %p54_p13 }
  0x1c   : > { %s42_s21 = ssub.s32 %s983_s28, %s1256_s17  ;;  %p745_p7 = scmp.lt.s32.totalorder %s987_s29, 2 }
  0x1d   : > { %s1242_s20 = scalar_select %p1106_p5, 1, 0 }
  0x1e   : > { %p45_p10 = scmp.eq.s32.totalorder %s42_s21, 0  ;;  %s269_s22 = sand.u32 1, %s975_s26  }
  0x1f   : > { %1243 = sst [smem:[#allocation17_spill]] %s1242_s20  ;;  %s694_s23 = sshll.u32 %s269_s22, 4 }
  0x20   : > { %s1115_s8 = scalar_select %p45_p10, %s975_s26, %s47_s18  }
  0x21   : > { %s716_s11 = sshll.u32 %s983_s28, 4  ;;  %s273_s16 = scalar_lea.vmem [#allocation2], %s694_s23 }
  0x22   : > { %1244 = sst [smem:[#allocation18_spill]] %s1115_s8  ;;  %s280_s15 = scalar_lea.hbm %s1216_s0, %s716_s11 }
  0x23   : > { %s284_s4 = sshll.u32 %s273_s16, 4  ;;  %s282_s10 = sshll.u32 %s280_s15, 4  ;;  %s285_s4 = int_to_ptr.vmem [resolvable:$true] %s284_s4  ;;  %s283_s10 = int_to_ptr.hbm [resolvable:$true] %s282_s10 }
  0x24   : > { %p734_p2 = pnand %p745_p7, %p1100_p3  ;;  %s302_s21 = scalar_lea.hbm %s1217_s1, %s716_s11 }
  0x25   : > { %s291_s20 = sand.u32 1, %s987_s29   ;;  %s270_s7 = scalar_lea.sflag [#allocation3], %s269_s22 }
  0x26   : > { %736 = dma.hbm_to_vmem [thread:$0]  (!%p734_p2), %s283_s10, 256, %s285_s4, %s270_s7  }
  0x27   : > { %s304_s18 = sshll.u32 %s302_s21, 4  ;;  %s295_s28 = scalar_lea.vmem [#allocation5], %s694_s23  ;;  %s305_s18 = int_to_ptr.hbm [resolvable:$true] %s304_s18 }
  0x28   : > { %s306_s8 = sshll.u32 %s295_s28, 4  ;;  %s292_s12 = scalar_lea.sflag [#allocation6], %s291_s20  ;;  %s307_s8 = int_to_ptr.vmem [resolvable:$true] %s306_s8 }
  0x29   : > { %739 = dma.hbm_to_vmem [thread:$0]  (!%p734_p2), %s305_s18, 256, %s307_s8, %s292_s12  }
  0x2a   : > { %315 = sbr.rel (%p1084_p8) target bundleno = 356 (0x164), region = 48  ;;  %s1130_s19 = sand.u32 (!%p1084_p8), 1, %s971_s25  }
  0x2b   : > { %s1133_s24 = sshll.u32 (!%p1084_p8), %s1130_s19, 4  ;;  %s318_s4 = scalar_lea.sflag (!%p1084_p8), [#allocation3], %s1130_s19 }
  0x2c   : > { %s321_s7 = scalar_lea.vmem (!%p1084_p8), [#allocation2], %s1133_s24 }
  0x2f   : > { %950 = dma.done.wait (%p1071_p4), %s318_s4, 256  }
  0x30   : > { %952 = vsyncadd (%p1071_p4), %s318_s4, 4294967040  ;;  %s327_s28 = sand.u32 1, %s1062_s30   ;;  %s331_s14 = scalar_lea.vmem [#allocation5], %s1133_s24 }
  0x31   : > { %s328_s10 = scalar_lea.sflag [#allocation6], %s327_s28 }
  0x32   : > { %954 = dma.done.wait (%p1071_p4), %s328_s10, 256  }
  0x33   : > { %956 = vsyncadd (%p1071_p4), %s328_s10, 4294967040 }
  0x34   : > { %958 = dma.done.wait (%p61_p1), [#allocation6], 128  }
  0x35   : > { %960 = vsyncadd (%p61_p1), [#allocation6], 4294967168  ;;  %v990_v0 = vmov 0   ;;  %vm382_vm0 = vcmask 64512   ;;  %v1151_v1 = vld [vmem:[%s321_s7] sm:$0xff]  ;;  %v1153_v2 = vld [vmem:[%s321_s7 + $0x8] sm:$0xff] }
  0x36   : > { %798 = vset.pattern.permute.xlu0 %v990_v0  ;;  %v376_v3 = vld [vmem:[%s1218_s2] sm:$0xff]  ;;  %444 = vmatpush.msra.mxu2 %v1151_v1  ;;  %v381_v5 = vld [vmem:[%s331_s14 + $0x8] sm:$0xff]  ;;  %s718_s13 = sshll.u32 %s979_s27, 4  ;;  %s1245_s21 = sld [smem:[#allocation20_spill]] }
  0x37   : > { %464 = vmatpush.msra.mxu3 %v1153_v2  ;;  %v380_v4 = vld [vmem:[%s331_s14] sm:$0xff]  ;;  %707 = vmatmul.msk.f32.vlgmr.msra.gmra.mxu2 %vm382_vm0, %v376_v3  ;;  %s372_s4 = scalar_lea.vmem [#allocation8], %s1133_s24  ;;  %s552_s27 = scalar_lea.sflag [#allocation4], %s1130_s19 }
  0x38   : > { %v379_v6 = vld [vmem:[%s1219_s3] sm:$0xff]  ;;  %708 = vmatmul.msk.f32.vlgmr.msra.gmra.mxu3 %vm382_vm0, %v376_v3  ;;  %401 = vmatpush.msra.mxu0 %v380_v4  ;;  %s567_s7 = sshll.u32 %s372_s4, 4  ;;  %s568_s7 = int_to_ptr.vmem [resolvable:$true] %s567_s7 }
  0x39   : > { %v469_v7 = vld [vmem:[%s1221_s5] sm:$0xff]  ;;  %421 = vmatpush.msra.mxu1 %v381_v5  ;;  %705 = vmatmul.msk.f32.vlgmr.msra.gmra.mxu0 %vm382_vm0, %v379_v6 }
  0x3a   : > { %706 = vmatmul.msk.f32.vlgmr.msra.gmra.mxu1 %vm382_vm0, %v379_v6  ;;  %472 = vperm.xlu0 %798, %v469_v7   ;;  %v480_v8 = vld [vmem:[%s1222_s6] sm:$0xff] }
  0x3b   : > { %v479_v20 = vld [vmem:[#allocation7] sm:$0xff] }
  0x3c   : > { %s565_s18 = scalar_lea.hbm %s1245_s21, %s718_s13  ;;  %s917_s20 = scalar_lea.hbm %s1245_s21, 32 }
  0x3d   : > { %s569_s28 = sshll.u32 %s565_s18, 4  ;;  %s570_s28 = int_to_ptr.hbm [resolvable:$true] %s569_s28 }
  0x3e   : > { %s911_s10 = sshra.s32 %s570_s28, 4  ;;  %s912_s10 = int_to_ptr.hbm [resolvable:$true] %s911_s10 }
  0x3f   : > { %s913_s14 = scalar_lea.hbm %s912_s10, 16  ;;  %p918_p11 = scmp.lt.s32.totalorder %s912_s10, %s1245_s21 }
  0x40   : > { %p914_p1 = scmp.ne.s32.totalorder %s912_s10, %s913_s14  ;;  %p919_p12 = scmp.lt.s32.totalorder %s917_s20, %s913_s14 }
  0x42   : > { %483 = vperm.xlu0 %798, %v480_v8   ;;  %p915_p4 = pnand %p914_p1, %p1106_p5  ;;  %p920_p13 = por %p919_p12, %p918_p11 }
  0x44   : > { %p916_p8 = pneg %p915_p4 }
  0x46   : > { %p921_p0 = pnand %p920_p13, %p916_p8 }
  0xac   : > { %v473_v15 = vpop.permute.xlu0 %472 }
  0xb4   : > { %v484_v21 = vpop.permute.xlu0 %483 }
  0xb6   : > { %v403_v9 = vpop.f32.mrf.mxu0 }
  0xb7   : > { %v423_v10 = vpop.f32.mrf.mxu1 }
  0xba   : > { %v446_v11 = vpop.f32.mrf.mxu2 }
  0xbb   : > { %v466_v12 = vpop.f32.mrf.mxu3  ;;  %v447_v13 = vadd.f32 %v446_v11, %v403_v9 }
  0xbc   : > { %v467_v14 = vadd.f32 %v466_v12, %v423_v10 }
  0xbd   : > { %v475_v16 = vadd.f32 %v473_v15, %v447_v13 }
  0xbe   : > { %v476_v17 = vadd.f32 %v473_v15, %v467_v14 }
  0xbf   : > { %v477_v18 = vmax.f32 %v475_v16, 0.0 }
  0xc0   : > { %v478_v19 = vmax.f32 %v476_v17, 0.0 }
  0xc1   : > { %504 = vmatpush.msrb.mxu0 %v477_v18 }
  0xc2   : > { %524 = vmatpush.msrb.mxu1 %v478_v19  ;;  %709 = vmatmul.msk.f32.vlgmr.msrb.gmra.mxu0 %vm382_vm0, %v479_v20 }
  0xc3   : > { %710 = vmatmul.msk.f32.vlgmr.msrb.gmra.mxu1 %vm382_vm0, %v479_v20 }
 0x13f   : > { %v506_v22 = vpop.f32.mrf.mxu0 }
 0x140   : > { %v526_v23 = vpop.f32.mrf.mxu1  ;;  %v507_v24 = vadd.f32 %v506_v22, %v484_v21 }
 0x141   : > { %v527_v25 = vadd.f32 %v526_v23, %v484_v21 }
 0x142   : > { %v529_v26 = vmax.f32 %v507_v24, -80.0 }
 0x143   : > { %v530_v27 = vmax.f32 %v527_v25, -80.0 }
 0x144   : > { %v531_v28 = vsub.f32 0.0, %v529_v26 }
 0x145   : > { %v532_v29 = vsub.f32 0.0, %v530_v27 }
 0x146   : > { %v533_v30 = vmul.f32 1.442695, %v531_v28 }
 0x147   : > { %v535_v31 = vmul.f32 1.442695, %v532_v29 }
 0x148   : > { %799 = vpow2.f32 %v533_v30 }
 0x149   : > { %801 = vpow2.f32 %v535_v31 }
 0x14e   : > { %v800_v32 = vpop.eup %799 }
 0x14f   : > { %v802_v33 = vpop.eup %801  ;;  %v537_v34 = vadd.f32 1.0, %v800_v32 }
 0x150   : > { %v538_v35 = vadd.f32 1.0, %v802_v33 }
 0x151   : > { %803 = vrcp.f32 %v537_v34 }
 0x152   : > { %805 = vrcp.f32 %v538_v35 }
 0x157   : > { %v804_v36 = vpop.eup %803 }
 0x158   : > { %v806_v37 = vpop.eup %805  ;;  %v541_v38 = vmul.f32 %v804_v36, %v537_v34 }
 0x159   : > { %v542_v39 = vmul.f32 %v806_v37, %v538_v35 }
 0x15a   : > { %v543_v40 = vsub.f32 2.0, %v541_v38 }
 0x15b   : > { %v544_v41 = vsub.f32 2.0, %v542_v39 }
 0x15c   : > { %v545_v42 = vmul.f32 %v804_v36, %v543_v40 }
 0x15d   : > { %v546_v43 = vmul.f32 %v806_v37, %v544_v41 }
 0x15e   : > { %v547_v44 = vmul.f32 %v545_v42, %v1151_v1 }
 0x15f   : > { %v548_v45 = vmul.f32 %v546_v43, %v1153_v2 }
 0x160   : > { %549 = vst [vmem:[%s372_s4] sm:$0xff] %v547_v44 }
 0x161   : > { %550 = vst [vmem:[%s372_s4 + $0x8] sm:$0xff] %v548_v45 }
 0x162   : > { %924 = shalt.err (!%p921_p0)
}
 0x163   : > { %727 = dma.vmem_to_hbm [thread:$0]  (%p1106_p5), %s568_s7, 256, %s570_s28, %s552_s27  }
 0x164 PF: > { %s1247_s19 = sld [smem:[#allocation13_spill]]  ;;  %p741_p3 = pnand %p693_p9, %p1076_p6 }
 0x166   : > { %p742_p7 = pneg %p741_p3 }
 0x16a   : > { %s581_s23 = sand.u32 1, %s1247_s19  }
 0x16b   : > { %s582_s8 = scalar_lea.sflag [#allocation4], %s581_s23 }
 0x16c   : > { %962 = dma.done.wait (%p742_p7), %s582_s8, 256  }
 0x16d   : > { %964 = vsyncadd (%p742_p7), %s582_s8, 4294967040  ;;  %s26_s29 = sadd.s32 1, %s987_s29   ;;  %s1249_s11 = sld [smem:[#allocation18_spill]] }
 0x16e   : > { %p23_p10 = scmp.ge.s32.totalorder %s26_s29, 4   ;;  %s1250_s27 = sld [smem:[#allocation14_spill]] }
 0x16f   : > { %s1251_s28 = sld [smem:[#allocation16_spill]]  ;;  %s1252_s24 = smov %s971_s25 }
 0x170   : > { %s1253_s25 = smov %s975_s26  ;;  %25 = sbr.rel (!%p23_p10) target bundleno = 11 (0xb), region = 110 }
 0x173   : > { %s1254_s26 = smov %s1249_s11 }
 0x175   :  { %588 = vsyncpa [#allocation3], 1 }
 0x176   :  { %590 = vsyncpa [#allocation3 + $0x1], 1 }
 0x177   :  { %591 = vsyncpa [#allocation6], 1 }
 0x178   :  { %593 = vsyncpa [#allocation6 + $0x1], 1 }
 0x179   :  { %594 = vsyncpa [#allocation4], 1 }
 0x17a   :  { %596 = vsyncpa [#allocation4 + $0x1], 1 }

// kernel: tpu_custom_call.1
= control target key start
LH: loop header
LB: loop body
LE: loop exit
PB: predicated region body
PF: predicated region fallthrough
CT: control target
= control target key end

     0   :  { %s1216_s0 = inlined_call_operand.hbm [shape: f32[2,8,256], index: 0, kind: input, shape index: {}]   ;;  %s1217_s1 = inlined_call_operand.hbm [shape: f32[2,8,256], index: 1, kind: input, shape index: {}]   ;;  %s1218_s2 = inlined_call_operand.vmem [shape: f32[8,8], index: 2, kind: input, shape index: {}]   ;;  %s1219_s3 = inlined_call_operand.vmem [shape: f32[8,8], index: 3, kind: input, shape index: {}]   ;;  %s1220_s4 = inlined_call_operand.hbm [shape: f32[8,8], index: 4, kind: input, shape index: {}]   ;;  %s1221_s5 = inlined_call_operand.vmem [shape: f32[8,1], index: 5, kind: input, shape index: {}]   ;;  %s1222_s6 = inlined_call_operand.vmem [shape: f32[8,1], index: 6, kind: input, shape index: {}]   ;;  %s1223_s7 = inlined_call_operand.hbm [shape: f32[2,8,256], index: 7, kind: output, shape index: {}]  }
   0x1   :  { %1231 = sst [smem:[#allocation19_spill]] %s1220_s4 }
   0x2   :  { %1232 = sst [smem:[#allocation20_spill]] %s1223_s7 }
   0x3   :  { %12 = vsyncpa [#allocation3], 0 }
   0x4   :  { %14 = vsyncpa [#allocation3 + $0x1], 0 }
   0x5   :  { %15 = vsyncpa [#allocation6], 0 }
   0x6   :  { %17 = vsyncpa [#allocation6 + $0x1], 0 }
   0x7   :  { %18 = vsyncpa [#allocation4], 0 }
   0x8   :  { %20 = vsyncpa [#allocation4 + $0x1], 0  ;;  %s1031_s24 = smov 0   ;;  %s1033_s25 = smov 0  }
   0x9   :  { %s1035_s26 = smov 0   ;;  %s1037_s27 = smov 0  }
   0xa   :  { %s1039_s28 = smov 0   ;;  %s1041_s29 = smov 0  }
   0xb LB: > { %1233 = sst [smem:[#allocation13_spill]] %s967_s24  ;;  %s1062_s30 = sadd.s32 4294967295, %s987_s29   ;;  %s987_s29 = sphi %s1041_s29, %s26_s29   ;;  %s983_s28 = sphi %s1039_s28, %s1251_s28   ;;  %s979_s27 = sphi %s1037_s27, %s1250_s27   ;;  %s975_s26 = sphi %s1035_s26, %s1254_s26   ;;  %s971_s25 = sphi %s1033_s25, %s1253_s25   ;;  %s967_s24 = sphi %s1031_s24, %s1252_s24  }
   0xc   : > { %1234 = sst [smem:[#allocation14_spill]] %s983_s28  ;;  %s690_s8 = sadd.s32 4294967294, %s987_s29  }
   0xd   : > { %p60_p0 = scmp.ne.s32.totalorder %s971_s25, %s967_s24  ;;  %p61_p1 = scmp.eq.s32.totalorder %s1062_s30, 0 }
   0xe   : > { %p219_p2 = scmp.eq.s32.totalorder %s1062_s30, 1  ;;  %p225_p3 = scmp.eq.s32.totalorder %s690_s8, 1 }
   0xf   : > { %p1071_p4 = por %p61_p1, %p60_p0  ;;  %p691_p5 = scmp.ge.s32.totalorder %s987_s29, 1 }
  0x10   : > { %p1076_p6 = por %p225_p3, %p60_p0  ;;  %p232_p7 = scmp.lt.s32.totalorder %s987_s29, 3 }
  0x11   : > { %s1238_s4 = sld [smem:[#allocation19_spill]]  ;;  %p693_p9 = scmp.ge.s32.totalorder %s987_s29, 2 }
  0x12   : > { %s1236_s10 = scalar_select %p1076_p6, 1, 0 }
  0x13   : > { %p1084_p8 = pnand %p691_p5, %p232_p7  ;;  %s989_s15 = smov [#allocation7]  }
  0x14   : > { %1237 = sst [smem:[#allocation15_spill]] %s1236_s10  ;;  %s252_s16 = sshll.u32 %s989_s15, 4  ;;  %s253_s16 = int_to_ptr.vmem [resolvable:$true] %s252_s16 }
  0x15   : > { %p729_p10 = pneg %p1084_p8  ;;  %s38_s17 = sadd.s32 1, %s983_s28 }
  0x16   : > { %p40_p12 = scmp.ge.s32.totalorder %s38_s17, 2  ;;  %s47_s18 = sadd.s32 1, %s975_s26 }
  0x17   : > { %s250_s13 = sshll.u32 %s1238_s4, 4  ;;  %p730_p11 = pnand %p729_p10, %p61_p1  ;;  %s251_s13 = int_to_ptr.hbm [resolvable:$true] %s250_s13 }
  0x18   : > { %p54_p13 = scmp.ne.s32.totalorder %s975_s26, %s971_s25  ;;  %p55_p0 = scmp.eq.s32.totalorder %s987_s29, 0 }
  0x19   : > { %732 = dma.hbm_to_vmem [thread:$0]  (!%p730_p11), %s251_s13, 128, %s253_s16, [#allocation6]  }
  0x1a   : > { %s1256_s17 = smov (%p40_p12, %s38_s17), 0  ;;  %p1100_p3 = por %p55_p0, %p54_p13 }
  0x1b   : > { %1240 = sst [smem:[#allocation16_spill]] %s1256_s17  ;;  %p1106_p5 = por %p219_p2, %p54_p13 }
  0x1c   : > { %s42_s21 = ssub.s32 %s983_s28, %s1256_s17  ;;  %p745_p7 = scmp.lt.s32.totalorder %s987_s29, 2 }
  0x1d   : > { %s1242_s20 = scalar_select %p1106_p5, 1, 0 }
  0x1e   : > { %p45_p10 = scmp.eq.s32.totalorder %s42_s21, 0  ;;  %s269_s22 = sand.u32 1, %s975_s26  }
  0x1f   : > { %1243 = sst [smem:[#allocation17_spill]] %s1242_s20  ;;  %s694_s23 = sshll.u32 %s269_s22, 4 }
  0x20   : > { %s1115_s8 = scalar_select %p45_p10, %s975_s26, %s47_s18  }
  0x21   : > { %s716_s11 = sshll.u32 %s983_s28, 4  ;;  %s273_s16 = scalar_lea.vmem [#allocation2], %s694_s23 }
  0x22   : > { %1244 = sst [smem:[#allocation18_spill]] %s1115_s8  ;;  %s280_s15 = scalar_lea.hbm %s1216_s0, %s716_s11 }
  0x23   : > { %s284_s4 = sshll.u32 %s273_s16, 4  ;;  %s282_s10 = sshll.u32 %s280_s15, 4  ;;  %s285_s4 = int_to_ptr.vmem [resolvable:$true] %s284_s4  ;;  %s283_s10 = int_to_ptr.hbm [resolvable:$true] %s282_s10 }
  0x24   : > { %p734_p2 = pnand %p745_p7, %p1100_p3  ;;  %s302_s21 = scalar_lea.hbm %s1217_s1, %s716_s11 }
  0x25   : > { %s291_s20 = sand.u32 1, %s987_s29   ;;  %s270_s7 = scalar_lea.sflag [#allocation3], %s269_s22 }
  0x26   : > { %736 = dma.hbm_to_vmem [thread:$0]  (!%p734_p2), %s283_s10, 256, %s285_s4, %s270_s7  }
  0x27   : > { %s304_s18 = sshll.u32 %s302_s21, 4  ;;  %s295_s28 = scalar_lea.vmem [#allocation5], %s694_s23  ;;  %s305_s18 = int_to_ptr.hbm [resolvable:$true] %s304_s18 }
  0x28   : > { %s306_s8 = sshll.u32 %s295_s28, 4  ;;  %s292_s12 = scalar_lea.sflag [#allocation6], %s291_s20  ;;  %s307_s8 = int_to_ptr.vmem [resolvable:$true] %s306_s8 }
  0x29   : > { %739 = dma.hbm_to_vmem [thread:$0]  (!%p734_p2), %s305_s18, 256, %s307_s8, %s292_s12  }
  0x2a   : > { %315 = sbr.rel (%p1084_p8) target bundleno = 356 (0x164), region = 48  ;;  %s1130_s19 = sand.u32 (!%p1084_p8), 1, %s971_s25  }
  0x2b   : > { %s1133_s24 = sshll.u32 (!%p1084_p8), %s1130_s19, 4  ;;  %s318_s4 = scalar_lea.sflag (!%p1084_p8), [#allocation3], %s1130_s19 }
  0x2c   : > { %s321_s7 = scalar_lea.vmem (!%p1084_p8), [#allocation2], %s1133_s24 }
  0x2f   : > { %950 = dma.done.wait (%p1071_p4), %s318_s4, 256  }
  0x30   : > { %952 = vsyncadd (%p1071_p4), %s318_s4, 4294967040  ;;  %s327_s28 = sand.u32 1, %s1062_s30   ;;  %s331_s14 = scalar_lea.vmem [#allocation5], %s1133_s24 }
  0x31   : > { %s328_s10 = scalar_lea.sflag [#allocation6], %s327_s28 }
  0x32   : > { %954 = dma.done.wait (%p1071_p4), %s328_s10, 256  }
  0x33   : > { %956 = vsyncadd (%p1071_p4), %s328_s10, 4294967040 }
  0x34   : > { %958 = dma.done.wait (%p61_p1), [#allocation6], 128  }
  0x35   : > { %960 = vsyncadd (%p61_p1), [#allocation6], 4294967168  ;;  %v990_v0 = vmov 0   ;;  %vm382_vm0 = vcmask 64512   ;;  %v1151_v1 = vld [vmem:[%s321_s7] sm:$0xff]  ;;  %v1153_v2 = vld [vmem:[%s321_s7 + $0x8] sm:$0xff] }
  0x36   : > { %798 = vset.pattern.permute.xlu0 %v990_v0  ;;  %v376_v3 = vld [vmem:[%s1218_s2] sm:$0xff]  ;;  %444 = vmatpush.msra.mxu2 %v1151_v1  ;;  %v381_v5 = vld [vmem:[%s331_s14 + $0x8] sm:$0xff]  ;;  %s718_s13 = sshll.u32 %s979_s27, 4  ;;  %s1245_s21 = sld [smem:[#allocation20_spill]] }
  0x37   : > { %464 = vmatpush.msra.mxu3 %v1153_v2  ;;  %v380_v4 = vld [vmem:[%s331_s14] sm:$0xff]  ;;  %707 = vmatmul.msk.f32.vlgmr.msra.gmra.mxu2 %vm382_vm0, %v376_v3  ;;  %s372_s4 = scalar_lea.vmem [#allocation8], %s1133_s24  ;;  %s552_s27 = scalar_lea.sflag [#allocation4], %s1130_s19 }
  0x38   : > { %v379_v6 = vld [vmem:[%s1219_s3] sm:$0xff]  ;;  %708 = vmatmul.msk.f32.vlgmr.msra.gmra.mxu3 %vm382_vm0, %v376_v3  ;;  %401 = vmatpush.msra.mxu0 %v380_v4  ;;  %s567_s7 = sshll.u32 %s372_s4, 4  ;;  %s568_s7 = int_to_ptr.vmem [resolvable:$true] %s567_s7 }
  0x39   : > { %v469_v7 = vld [vmem:[%s1221_s5] sm:$0xff]  ;;  %421 = vmatpush.msra.mxu1 %v381_v5  ;;  %705 = vmatmul.msk.f32.vlgmr.msra.gmra.mxu0 %vm382_vm0, %v379_v6 }
  0x3a   : > { %706 = vmatmul.msk.f32.vlgmr.msra.gmra.mxu1 %vm382_vm0, %v379_v6  ;;  %472 = vperm.xlu0 %798, %v469_v7   ;;  %v480_v8 = vld [vmem:[%s1222_s6] sm:$0xff] }
  0x3b   : > { %v479_v20 = vld [vmem:[#allocation7] sm:$0xff] }
  0x3c   : > { %s565_s18 = scalar_lea.hbm %s1245_s21, %s718_s13  ;;  %s917_s20 = scalar_lea.hbm %s1245_s21, 32 }
  0x3d   : > { %s569_s28 = sshll.u32 %s565_s18, 4  ;;  %s570_s28 = int_to_ptr.hbm [resolvable:$true] %s569_s28 }
  0x3e   : > { %s911_s10 = sshra.s32 %s570_s28, 4  ;;  %s912_s10 = int_to_ptr.hbm [resolvable:$true] %s911_s10 }
  0x3f   : > { %s913_s14 = scalar_lea.hbm %s912_s10, 16  ;;  %p918_p11 = scmp.lt.s32.totalorder %s912_s10, %s1245_s21 }
  0x40   : > { %p914_p1 = scmp.ne.s32.totalorder %s912_s10, %s913_s14  ;;  %p919_p12 = scmp.lt.s32.totalorder %s917_s20, %s913_s14 }
  0x42   : > { %483 = vperm.xlu0 %798, %v480_v8   ;;  %p915_p4 = pnand %p914_p1, %p1106_p5  ;;  %p920_p13 = por %p919_p12, %p918_p11 }
  0x44   : > { %p916_p8 = pneg %p915_p4 }
  0x46   : > { %p921_p0 = pnand %p920_p13, %p916_p8 }
  0xac   : > { %v473_v15 = vpop.permute.xlu0 %472 }
  0xb4   : > { %v484_v21 = vpop.permute.xlu0 %483 }
  0xb6   : > { %v403_v9 = vpop.f32.mrf.mxu0 }
  0xb7   : > { %v423_v10 = vpop.f32.mrf.mxu1 }
  0xba   : > { %v446_v11 = vpop.f32.mrf.mxu2 }
  0xbb   : > { %v466_v12 = vpop.f32.mrf.mxu3  ;;  %v447_v13 = vadd.f32 %v446_v11, %v403_v9 }
  0xbc   : > { %v467_v14 = vadd.f32 %v466_v12, %v423_v10 }
  0xbd   : > { %v475_v16 = vadd.f32 %v473_v15, %v447_v13 }
  0xbe   : > { %v476_v17 = vadd.f32 %v473_v15, %v467_v14 }
  0xbf   : > { %v477_v18 = vmax.f32 %v475_v16, 0.0 }
  0xc0   : > { %v478_v19 = vmax.f32 %v476_v17, 0.0 }
  0xc1   : > { %504 = vmatpush.msrb.mxu0 %v477_v18 }
  0xc2   : > { %524 = vmatpush.msrb.mxu1 %v478_v19  ;;  %709 = vmatmul.msk.f32.vlgmr.msrb.gmra.mxu0 %vm382_vm0, %v479_v20 }
  0xc3   : > { %710 = vmatmul.msk.f32.vlgmr.msrb.gmra.mxu1 %vm382_vm0, %v479_v20 }
 0x13f   : > { %v506_v22 = vpop.f32.mrf.mxu0 }
 0x140   : > { %v526_v23 = vpop.f32.mrf.mxu1  ;;  %v507_v24 = vadd.f32 %v506_v22, %v484_v21 }
 0x141   : > { %v527_v25 = vadd.f32 %v526_v23, %v484_v21 }
 0x142   : > { %v529_v26 = vmax.f32 %v507_v24, -80.0 }
 0x143   : > { %v530_v27 = vmax.f32 %v527_v25, -80.0 }
 0x144   : > { %v531_v28 = vsub.f32 0.0, %v529_v26 }
 0x145   : > { %v532_v29 = vsub.f32 0.0, %v530_v27 }
 0x146   : > { %v533_v30 = vmul.f32 1.442695, %v531_v28 }
 0x147   : > { %v535_v31 = vmul.f32 1.442695, %v532_v29 }
 0x148   : > { %799 = vpow2.f32 %v533_v30 }
 0x149   : > { %801 = vpow2.f32 %v535_v31 }
 0x14e   : > { %v800_v32 = vpop.eup %799 }
 0x14f   : > { %v802_v33 = vpop.eup %801  ;;  %v537_v34 = vadd.f32 1.0, %v800_v32 }
 0x150   : > { %v538_v35 = vadd.f32 1.0, %v802_v33 }
 0x151   : > { %803 = vrcp.f32 %v537_v34 }
 0x152   : > { %805 = vrcp.f32 %v538_v35 }
 0x157   : > { %v804_v36 = vpop.eup %803 }
 0x158   : > { %v806_v37 = vpop.eup %805  ;;  %v541_v38 = vmul.f32 %v804_v36, %v537_v34 }
 0x159   : > { %v542_v39 = vmul.f32 %v806_v37, %v538_v35 }
 0x15a   : > { %v543_v40 = vsub.f32 2.0, %v541_v38 }
 0x15b   : > { %v544_v41 = vsub.f32 2.0, %v542_v39 }
 0x15c   : > { %v545_v42 = vmul.f32 %v804_v36, %v543_v40 }
 0x15d   : > { %v546_v43 = vmul.f32 %v806_v37, %v544_v41 }
 0x15e   : > { %v547_v44 = vmul.f32 %v545_v42, %v1151_v1 }
 0x15f   : > { %v548_v45 = vmul.f32 %v546_v43, %v1153_v2 }
 0x160   : > { %549 = vst [vmem:[%s372_s4] sm:$0xff] %v547_v44 }
 0x161   : > { %550 = vst [vmem:[%s372_s4 + $0x8] sm:$0xff] %v548_v45 }
 0x162   : > { %924 = shalt.err (!%p921_p0)
}
 0x163   : > { %727 = dma.vmem_to_hbm [thread:$0]  (%p1106_p5), %s568_s7, 256, %s570_s28, %s552_s27  }
 0x164 PF: > { %s1247_s19 = sld [smem:[#allocation13_spill]]  ;;  %p741_p3 = pnand %p693_p9, %p1076_p6 }
 0x166   : > { %p742_p7 = pneg %p741_p3 }
 0x16a   : > { %s581_s23 = sand.u32 1, %s1247_s19  }
 0x16b   : > { %s582_s8 = scalar_lea.sflag [#allocation4], %s581_s23 }
 0x16c   : > { %962 = dma.done.wait (%p742_p7), %s582_s8, 256  }
 0x16d   : > { %964 = vsyncadd (%p742_p7), %s582_s8, 4294967040  ;;  %s26_s29 = sadd.s32 1, %s987_s29   ;;  %s1249_s11 = sld [smem:[#allocation18_spill]] }
 0x16e   : > { %p23_p10 = scmp.ge.s32.totalorder %s26_s29, 4   ;;  %s1250_s27 = sld [smem:[#allocation14_spill]] }
 0x16f   : > { %s1251_s28 = sld [smem:[#allocation16_spill]]  ;;  %s1252_s24 = smov %s971_s25 }
 0x170   : > { %s1253_s25 = smov %s975_s26  ;;  %25 = sbr.rel (!%p23_p10) target bundleno = 11 (0xb), region = 110 }
 0x173   : > { %s1254_s26 = smov %s1249_s11 }
 0x175   :  { %588 = vsyncpa [#allocation3], 1 }
 0x176   :  { %590 = vsyncpa [#allocation3 + $0x1], 1 }
 0x177   :  { %591 = vsyncpa [#allocation6], 1 }
 0x178   :  { %593 = vsyncpa [#allocation6 + $0x1], 1 }
 0x179   :  { %594 = vsyncpa [#allocation4], 1 }
 0x17a   :  { %596 = vsyncpa [#allocation4 + $0x1], 1 }

</bundles_post_ra>
